<compile_context>
chip_gen: v6e
topology: v6e:2x2x1
jax: 0.10.0
libtpu: 0.0.40
codegen_flags: <defaults>
</compile_context>

<pallas_src>
import functools

import jax
import jax.numpy as jnp
from jax.experimental import pallas as pl
from jax.experimental.pallas import tpu as pltpu

_LANE = 128              # lane width of the flattened slab
_TM_TARGET = 8192        # rows per block -> 8192*128*4 B = 4 MiB per f32 input
_SPLIT_ROWS = 2048       # >1 MiB: force >=2 grid steps so v7x megacore engages
_PF_FUSE_MAX_ROWS = 4096 # fuse pred_fake into the main kernel if <=2 MiB (f32)


# ------------------------------------------------------------------ helpers -
def _cdiv(a, b):
    return -(-a // b)


def _round_up(x, m):
    return ((x + m - 1) // m) * m


def _flat_split(x):
    """Flatten `x` without any full-tensor pad copy.

    Returns (main, tail, numel) where `main` is a lane-dense (rows, 128) view
    of the first rows*128 elements (None if numel < 128) and `tail` holds the
    remaining <128 elements (None if numel % 128 == 0).
    """
    flat = x.reshape(-1)
    n = flat.shape[0]
    rows = n // _LANE
    if n % _LANE == 0:
        main = flat.reshape(rows, _LANE) if rows else None
        tail = None
    else:
        main = flat[: rows * _LANE].reshape(rows, _LANE) if rows else None
        tail = flat[rows * _LANE:]
    return main, tail, n


def _block_plan(rows):
    """Pick block height + grid size.

    Small inputs (<=1 MiB) use one full-extent block (no 8-alignment issue,
    no masking).  Larger inputs get ~4 MiB blocks but always >=2 grid steps so
    a 'parallel' grid axis can be split across v7x's two TensorCores.
    """
    if rows <= _SPLIT_ROWS:
        return rows, 1
    tm = min(_TM_TARGET, _round_up(_cdiv(rows, 2), 8))
    return tm, _cdiv(rows, tm)


def _vmem_budget(inputs, tm, fuse_dis):
    """Derive vmem_limit_bytes from the actual plan (2 buffers per input)."""
    total = 0
    for idx, arr in enumerate(inputs):
        itemsize = arr.dtype.itemsize
        if fuse_dis and idx == len(inputs) - 1:
            # pred_fake: whole slab resident (constant index_map).
            total += 2 * arr.shape[0] * _LANE * itemsize
        else:
            total += 2 * tm * _LANE * itemsize
    total += 4 * 2 * _LANE * 4      # (1,128) partial-sum output buffers
    total += 4 << 20                # slack for compiler-internal scratch
    return max(min(total, 64 << 20), 16 << 20)


# ------------------------------------------------------------------ kernel --
def _make_fused_kernel(*, with_id, with_dis, nblk, tm, rows_full):
    """Fused per-block partial sums:
         |real - cycle|  (always), |real - id| (optional), (pred_fake - 1)^2
       `real` is loaded from HBM once per block and reused for both L1 terms;
       the pred_fake MSE is computed only on grid step 0."""

    def kernel(*refs):
        it = iter(refs)
        real_ref = next(it)
        cycle_ref = next(it)
        id_ref = next(it) if with_id else None
        pf_ref = next(it) if with_dis else None
        cyc_out = next(it)
        id_out = next(it) if with_id else None
        dis_out = next(it) if with_dis else None

        i = pl.program_id(0)

        def l1_body(mask_rows):
            r = real_ref[...].astype(jnp.float32)
            d_cyc = jnp.abs(r - cycle_ref[...].astype(jnp.float32))
            d_id = (jnp.abs(r - id_ref[...].astype(jnp.float32))
                    if with_id else None)
            if mask_rows:
                # Row-index compare only (no column iota, no flat index).
                row_ok = (jax.lax.broadcasted_iota(jnp.int32, (tm, 1), 0)
                          + i * tm) < rows_full
                d_cyc = jnp.where(row_ok, d_cyc, 0.0)
                if with_id:
                    d_id = jnp.where(row_ok, d_id, 0.0)
            cyc_out[...] = jnp.sum(d_cyc, axis=0, keepdims=True)   # (1, 128)
            if with_id:
                id_out[...] = jnp.sum(d_id, axis=0, keepdims=True)

        if nblk * tm != rows_full:
            # Only the last block can contain out-of-range rows.
            @pl.when(i == nblk - 1)
            def _():
                l1_body(True)

            @pl.when(i != nblk - 1)
            def _():
                l1_body(False)
        else:
            l1_body(False)

        if with_dis:
            if nblk == 1:
                d = pf_ref[...].astype(jnp.float32) - 1.0
                dis_out[...] = jnp.sum(d * d, axis=0, keepdims=True)
            else:
                @pl.when(i == 0)
                def _():
                    d = pf_ref[...].astype(jnp.float32) - 1.0
                    dis_out[...] = jnp.sum(d * d, axis=0, keepdims=True)

                @pl.when(i != 0)
                def _():
                    dis_out[...] = jnp.zeros_like(dis_out)

    return kernel


# ----------------------------------------------------------------- wrapper --
def cyclegan_generator_loss(real, pred_fake, cycle, id=None,
                            identity=False, lam=10.0):
    """Forward pass of CycleGANGeneratorLoss (returns a scalar f32)."""
    if identity:
        assert id is not None
    assert cycle.size == real.size, "L1 mean requires matching element counts"
    if identity:
        assert id.size == real.size, "L1 mean requires matching element counts"

    r_main, r_tail, n = _flat_split(real)
    c_main, c_tail, _ = _flat_split(cycle)
    with_id = identity
    if with_id:
        i_main, i_tail, _ = _flat_split(id)
    pf_main, pf_tail, n_pf = _flat_split(pred_fake)

    lam = jnp.float32(lam)

    # Degenerate case: real/cycle smaller than one lane row -> plain jnp.
    if r_main is None:
        rf = real.astype(jnp.float32).reshape(-1)
        cf = cycle.astype(jnp.float32).reshape(-1)
        pf = pred_fake.astype(jnp.float32).reshape(-1)
        loss = jnp.mean((pf - 1.0) ** 2) + lam * jnp.mean(jnp.abs(rf - cf))
        if with_id:
            idf = id.astype(jnp.float32).reshape(-1)
            loss = loss + 0.5 * lam * jnp.mean(jnp.abs(rf - idf))
        return loss

    rows = r_main.shape[0]
    tm, nblk = _block_plan(rows)

    fuse_dis = pf_main is not None and pf_main.shape[0] <= _PF_FUSE_MAX_ROWS

    kernel = _make_fused_kernel(with_id=with_id, with_dis=fuse_dis,
                                nblk=nblk, tm=tm, rows_full=rows)

    stream_spec = pl.BlockSpec((tm, _LANE), lambda i: (i, 0))
    in_specs = [stream_spec, stream_spec]
    inputs = [r_main, c_main]
    if with_id:
        in_specs.append(stream_spec)
        inputs.append(i_main)
    if fuse_dis:
        pf_rows = pf_main.shape[0]
        # Whole pred_fake slab resident in VMEM; constant block index so it is
        # fetched once (tiny PatchGAN map).
        in_specs.append(pl.BlockSpec((pf_rows, _LANE), lambda i: (0, 0)))
        inputs.append(pf_main)

    part_spec = pl.BlockSpec((1, _LANE), lambda i: (i, 0))
    part_shape = jax.ShapeDtypeStruct((nblk, _LANE), jnp.float32)
    n_outs = 1 + int(with_id) + int(fuse_dis)

    outs = pl.pallas_call(
        kernel,
        out_shape=tuple([part_shape] * n_outs),
        grid=(nblk,),
        in_specs=in_specs,
        out_specs=tuple([part_spec] * n_outs),
        compiler_params=pltpu.CompilerParams(
            dimension_semantics=("parallel",),
            vmem_limit_bytes=_vmem_budget(inputs, tm, fuse_dis)),
    )(*inputs)

    outs = list(outs)
    cyc_sum = jnp.sum(outs.pop(0))
    id_sum = jnp.sum(outs.pop(0)) if with_id else None
    dis_sum = jnp.sum(outs.pop(0)) if fuse_dis else None

    # Lane tails (<128 elements) folded in plain jnp -- no pad copy needed.
    if r_tail is not None:
        rt = r_tail.astype(jnp.float32)
        cyc_sum = cyc_sum + jnp.sum(jnp.abs(rt - c_tail.astype(jnp.float32)))
        if with_id:
            id_sum = id_sum + jnp.sum(jnp.abs(rt - i_tail.astype(jnp.float32)))
    if fuse_dis:
        if pf_tail is not None:
            pt = pf_tail.astype(jnp.float32) - 1.0
            dis_sum = dis_sum + jnp.sum(pt * pt)
    else:
        # pred_fake is either tiny (<128 elems) or unusually large; plain XLA.
        pf = pred_fake.astype(jnp.float32)
        dis_sum = jnp.sum((pf - 1.0) ** 2)

    loss = dis_sum / jnp.float32(n_pf) + lam * (cyc_sum / jnp.float32(n))
    if with_id:
        loss = loss + 0.5 * lam * (id_sum / jnp.float32(n))
    return loss


# --------------------------------------------------------------- reference --
def _reference_loss(real, pred_fake, cycle, id=None, identity=False, lam=10.0):
    real = real.astype(jnp.float32)
    pred_fake = pred_fake.astype(jnp.float32)
    cycle = cycle.astype(jnp.float32)
    dis = jnp.mean((pred_fake - 1.0) ** 2)
    cyc = jnp.mean(jnp.abs(real - cycle))
    loss = dis + lam * cyc
    if identity:
        loss = loss + 0.5 * lam * jnp.mean(jnp.abs(real - id.astype(jnp.float32)))
    return loss


if __name__ == "__main__":
    key = jax.random.PRNGKey(0)
    k1, k2, k3, k4, k5, k6, k7 = jax.random.split(key, 7)

    # Small shapes consistent with the module (images + PatchGAN-style map).
    B, C, H, W = 2, 4, 16, 16
    real = jax.random.normal(k1, (B, C, H, W), dtype=jnp.float32)
    cycle = jax.random.normal(k2, (B, C, H, W), dtype=jnp.float32)
    id_img = jax.random.normal(k3, (B, C, H, W), dtype=jnp.float32)
    pred_fake = jax.random.normal(k4, (B, 1, H, W), dtype=jnp.float32)

    loss_fn = jax.jit(functools.partial(cyclegan_generator_loss, identity=False))
    loss_fn_id = jax.jit(functools.partial(cyclegan_generator_loss, identity=True))

    # identity=False path (default CycleGANGeneratorLoss())
    loss = jax.block_until_ready(loss_fn(real, pred_fake, cycle))
    ref = _reference_loss(real, pred_fake, cycle)
    assert jnp.allclose(loss, ref, rtol=1e-5, atol=1e-5), (loss, ref)

    # identity=True path
    loss_id = jax.block_until_ready(loss_fn_id(real, pred_fake, cycle, id=id_img))
    ref_id = _reference_loss(real, pred_fake, cycle, id=id_img, identity=True)
    assert jnp.allclose(loss_id, ref_id, rtol=1e-5, atol=1e-5), (loss_id, ref_id)

    # Ragged / multi-block path: odd element count (lane tail) + rows > split
    # threshold (partial last block exercises the pl.when-gated row mask).
    real2 = jax.random.normal(k5, (1, 3, 300, 300), dtype=jnp.float32)
    cycle2 = jax.random.normal(k6, (1, 3, 300, 300), dtype=jnp.float32)
    pred2 = jax.random.normal(k7, (1, 1, 17, 19), dtype=jnp.float32)
    loss2 = jax.block_until_ready(loss_fn(real2, pred2, cycle2))
    ref2 = _reference_loss(real2, pred2, cycle2)
    assert jnp.allclose(loss2, ref2, rtol=1e-4, atol=1e-5), (loss2, ref2)

    print("KERNEL_OK")
</pallas_src>

<mosaic_0001>
module attributes {stable_mosaic.version = 11 : i64} {
  func.func @kernel(%arg0: i32, %arg1: memref<16x128xf32, #tpu.memory_space<vmem>>, %arg2: memref<16x128xf32, #tpu.memory_space<vmem>>, %arg3: memref<4x128xf32, #tpu.memory_space<vmem>>, %arg4: memref<1x128xf32, #tpu.memory_space<vmem>>, %arg5: memref<1x128xf32, #tpu.memory_space<vmem>>) attributes {dimension_semantics = [#tpu.dimension_semantics<parallel>], iteration_bounds = array<i64: 1>, scalar_prefetch = 0 : i64, scratch_operands = 0 : i64, tpu.core_type = #tpu.core_type<tc>, window_params = [{transform_indices = @transform_0, window_bounds = array<i64: 16, 128>}, {transform_indices = @transform_1, window_bounds = array<i64: 16, 128>}, {pipeline_mode = #tpu.pipeline_mode<synchronous>, transform_indices = @transform_2, window_bounds = array<i64: 4, 128>}, {transform_indices = @transform_3, window_bounds = array<i64: 1, 128>}, {transform_indices = @transform_4, window_bounds = array<i64: 1, 128>}]} {
    %c0 = arith.constant 0 : index
    %c0_0 = arith.constant 0 : index
    %0 = vector.load %arg1[%c0, %c0_0] : memref<16x128xf32, #tpu.memory_space<vmem>>, vector<16x128xf32>
    %c0_1 = arith.constant 0 : index
    %c0_2 = arith.constant 0 : index
    %1 = vector.load %arg2[%c0_1, %c0_2] : memref<16x128xf32, #tpu.memory_space<vmem>>, vector<16x128xf32>
    %2 = arith.subf %0, %1 : vector<16x128xf32>
    %3 = math.absf %2 : vector<16x128xf32>
    %cst = arith.constant dense<0.000000e+00> : vector<128xf32>
    %4 = vector.multi_reduction <add>, %3, %cst [0] : vector<16x128xf32> to vector<128xf32>
    %5 = vector.shape_cast %4 : vector<128xf32> to vector<1x128xf32>
    %c0_3 = arith.constant 0 : index
    %c0_4 = arith.constant 0 : index
    %6 = vector.load %arg4[%c0_3, %c0_4] : memref<1x128xf32, #tpu.memory_space<vmem>>, vector<1x128xf32>
    tpu.vector_store %arg4[%c0_3, %c0_4], %5 {strides = array<i32>} : memref<1x128xf32, #tpu.memory_space<vmem>>, vector<1x128xf32>,
    %c0_5 = arith.constant 0 : index
    %c0_6 = arith.constant 0 : index
    %7 = vector.load %arg3[%c0_5, %c0_6] : memref<4x128xf32, #tpu.memory_space<vmem>>, vector<4x128xf32>
    %cst_7 = arith.constant 1.000000e+00 : f32
    %8 = vector.broadcast %cst_7 : f32 to vector<4x128xf32>
    %9 = arith.subf %7, %8 : vector<4x128xf32>
    %10 = arith.mulf %9, %9 : vector<4x128xf32>
    %cst_8 = arith.constant dense<0.000000e+00> : vector<128xf32>
    %11 = vector.multi_reduction <add>, %10, %cst_8 [0] : vector<4x128xf32> to vector<128xf32>
    %12 = vector.shape_cast %11 : vector<128xf32> to vector<1x128xf32>
    %c0_9 = arith.constant 0 : index
    %c0_10 = arith.constant 0 : index
    %13 = vector.load %arg5[%c0_9, %c0_10] : memref<1x128xf32, #tpu.memory_space<vmem>>, vector<1x128xf32>
    tpu.vector_store %arg5[%c0_9, %c0_10], %12 {strides = array<i32>} : memref<1x128xf32, #tpu.memory_space<vmem>>, vector<1x128xf32>,
    return
  }
  func.func @transform_0(%arg0: i32) -> (i32, i32) {
    %c0_i32 = arith.constant 0 : i32
    %c0_i32_0 = arith.constant 0 : i32
    return %arg0, %c0_i32 : i32, i32
  }
  func.func @transform_1(%arg0: i32) -> (i32, i32) {
    %c0_i32 = arith.constant 0 : i32
    %c0_i32_0 = arith.constant 0 : i32
    return %arg0, %c0_i32 : i32, i32
  }
  func.func @transform_2(%arg0: i32) -> (i32, i32) {
    %c0_i32 = arith.constant 0 : i32
    %c0_i32_0 = arith.constant 0 : i32
    %c0_i32_1 = arith.constant 0 : i32
    return %c0_i32, %c0_i32_0 : i32, i32
  }
  func.func @transform_3(%arg0: i32) -> (i32, i32) {
    %c0_i32 = arith.constant 0 : i32
    %c0_i32_0 = arith.constant 0 : i32
    return %arg0, %c0_i32 : i32, i32
  }
  func.func @transform_4(%arg0: i32) -> (i32, i32) {
    %c0_i32 = arith.constant 0 : i32
    %c0_i32_0 = arith.constant 0 : i32
    return %arg0, %c0_i32 : i32, i32
  }
}

</mosaic_0001>

<bundles_post_ra>
// kernel: cyclegan_generator_loss.1
= control target key start
LH: loop header
LB: loop body
LE: loop exit
PB: predicated region body
PF: predicated region fallthrough
CT: control target
= control target key end

     0   :  { %vm35_vm0 = vcmask 1043456   ;;  %s99_s0 = inlined_call_operand.vmem [shape: f32[16,128], index: 0, kind: input, shape index: {}]   ;;  %s100_s1 = inlined_call_operand.vmem [shape: f32[16,128], index: 1, kind: input, shape index: {}]   ;;  %s101_s2 = inlined_call_operand.vmem [shape: f32[4,128], index: 2, kind: input, shape index: {}]   ;;  %s102_s4 = inlined_call_operand.vmem [shape: f32[1,128], index: 4, kind: output, shape index: {1}]   ;;  %s103_s3 = inlined_call_operand.vmem [shape: f32[1,128], index: 3, kind: output, shape index: {0}]  }
   0x1   :  { %v16_v0 = vld [vmem:[%s99_s0] sm:$0xff]  ;;  %v17_v1 = vld [vmem:[%s99_s0 + $0x8] sm:$0xff] }
   0x2   :  { %v18_v2 = vld [vmem:[%s100_s1] sm:$0xff]  ;;  %v19_v3 = vld [vmem:[%s100_s1 + $0x8] sm:$0xff] }
   0x3   :  { %v20_v4 = vsub.f32 %v16_v0, %v18_v2  ;;  %v32_v5 = vld [vmem:[%s101_s2] sm:$0xf]  ;;  %v21_v6 = vsub.f32 %v17_v1, %v19_v3 }
   0x4   :  { %v52_v7 = vadd.f32 -1.0, %v32_v5 }
   0x5   :  { %v22_v8 = vand.u32 2147483647, %v20_v4  ;;  %v23_v9 = vand.u32 2147483647, %v21_v6 }
   0x6   :  { %v34_v10 = vmul.f32 %v52_v7, %v52_v7 }
   0x7   :  { %v24_v11 = vadd.f32 %v23_v9, %v22_v8 }
   0x8   :  { %v36_v12 = vsel %vm35_vm0, %v34_v10, 0.0 }
   0x9   :  { %v37_v13 = vrot.slane %v36_v12, 4  ;;  %v25_v14 = vrot.slane %v24_v11, 4 }
   0xb   :  { %v38_v15 = vadd.f32 %v37_v13, %v36_v12  ;;  %v26_v16 = vadd.f32 %v25_v14, %v24_v11 }
   0xd   :  { %v39_v17 = vrot.slane %v38_v15, 2  ;;  %v27_v18 = vrot.slane %v26_v16, 2 }
   0xf   :  { %v40_v19 = vadd.f32 %v39_v17, %v38_v15  ;;  %v28_v20 = vadd.f32 %v27_v18, %v26_v16 }
  0x11   :  { %v41_v21 = vrot.slane %v40_v19, 1  ;;  %v29_v22 = vrot.slane %v28_v20, 1 }
  0x13   :  { %v42_v23 = vadd.f32 %v41_v21, %v40_v19  ;;  %v30_v24 = vadd.f32 %v29_v22, %v28_v20 }
  0x15   :  { %43 = vst [vmem:[%s102_s4] sm:$0x1] %v42_v23  ;;  %31 = vst [vmem:[%s103_s3] sm:$0x1] %v30_v24 }

</bundles_post_ra>
